<compile_context>
chip_gen: v5e
topology: v5e:2x2
jax: 0.10.0
libtpu: 0.0.40
codegen_flags: <defaults>
</compile_context>

<pallas_src>
import functools

import jax
import jax.numpy as jnp
from jax.experimental import pallas as pl
from jax.experimental.pallas import tpu as pltpu

_ROW_ALIGN = 16                          # sublane-friendly for f32 and bf16 tiles
_STREAM_VMEM_BUDGET = 16 * 1024 * 1024   # bytes for double-buffered x/out tiles
_MIN_MEGACORE_TILE = 512                 # don't force a megacore split below this


def _round_up(n, m):
    return ((n + m - 1) // m) * m


def _num_tensorcores():
    """Best-effort TensorCore count (1 on v5e/v6e, 2 on v7x). Defaults to 1."""
    try:
        info = pltpu.get_tpu_info()
        for attr in ("num_cores", "num_tensorcores", "tensorcores_per_chip",
                     "core_count"):
            n = getattr(info, attr, None)
            if isinstance(n, int) and n > 0:
                return n
    except Exception:
        pass
    return 1


# --------------------------------------------------------------------------- kernels
def _paraphraser3_kernel(x_ref, w1_ref, b1_ref, w2_ref, b2_ref, w3_ref, b3_ref,
                         o_ref, *, compute_dtype):
    # Cast to the MXU compute dtype inside the kernel (free under the memory bound);
    # accumulate, bias-add and tanh stay f32.
    x = x_ref[...].astype(compute_dtype)
    h1 = jnp.tanh(
        jnp.dot(x, w1_ref[...].astype(compute_dtype),
                preferred_element_type=jnp.float32)
        + b1_ref[...].astype(jnp.float32))
    h2 = jnp.tanh(
        jnp.dot(h1.astype(compute_dtype), w2_ref[...].astype(compute_dtype),
                preferred_element_type=jnp.float32)
        + b2_ref[...].astype(jnp.float32))
    out = (
        jnp.dot(h2.astype(compute_dtype), w3_ref[...].astype(compute_dtype),
                preferred_element_type=jnp.float32)
        + b3_ref[...].astype(jnp.float32))
    o_ref[...] = out.astype(o_ref.dtype)


def _paraphraser2_kernel(x_ref, w1_ref, b1_ref, w3_ref, b3_ref, o_ref,
                         *, compute_dtype):
    x = x_ref[...].astype(compute_dtype)
    h1 = jnp.tanh(
        jnp.dot(x, w1_ref[...].astype(compute_dtype),
                preferred_element_type=jnp.float32)
        + b1_ref[...].astype(jnp.float32))
    out = (
        jnp.dot(h1.astype(compute_dtype), w3_ref[...].astype(compute_dtype),
                preferred_element_type=jnp.float32)
        + b3_ref[...].astype(jnp.float32))
    o_ref[...] = out.astype(o_ref.dtype)


# --------------------------------------------------------------------------- wrapper
def paraphraser_forward(x, params, *, num_layers=3, tb=4096,
                        out_dtype=jnp.bfloat16, compute_dtype=jnp.bfloat16):
    """Fused Paraphraser MLP forward.

    x: (B, in_dim) in any float dtype (read as-is; cast to compute_dtype in-kernel).
    params: (w1, b1, w2, b2, w3, b3); weights (fan_in, fan_out), biases (1, fan_out).
    num_layers: 3 (layer1->layer2->layer3) or 2 (layer1->layer3), as in the module.
    """
    if num_layers not in (2, 3):
        raise Exception("num_layers must be 2 or 3")

    w1, b1, w2, b2, w3, b3 = params
    B, in_dim = x.shape
    hidden_dim = w1.shape[1]
    out_dim = w3.shape[1]
    out_dtype = jnp.dtype(out_dtype)
    compute_dtype = jnp.dtype(compute_dtype)

    # --- batch-tile selection ---------------------------------------------------
    # Double-buffered streaming bytes per row (x read in its own dtype + out write).
    bytes_per_row = 2 * (in_dim * x.dtype.itemsize + out_dim * out_dtype.itemsize)
    tile_cap = max(_ROW_ALIGN,
                   (_STREAM_VMEM_BUDGET // bytes_per_row) // _ROW_ALIGN * _ROW_ALIGN)
    tile_max = max(_ROW_ALIGN, (min(tb, tile_cap) // _ROW_ALIGN) * _ROW_ALIGN)

    n_steps = pl.cdiv(B, tile_max)          # fewest steps that respect the budget

    # Megacore (v7x): only split when the chip actually has >1 TC and when each
    # core gets >= 2 grid steps of a reasonably sized tile. Skipped on v5e/v6e.
    n_cores = _num_tensorcores()
    if (n_cores > 1 and n_steps < 2 * n_cores
            and B >= 2 * n_cores * _MIN_MEGACORE_TILE):
        n_steps = 2 * n_cores

    tile = _round_up(pl.cdiv(B, n_steps), _ROW_ALIGN)
    Bp = n_steps * tile                     # padding waste <= 16*n_steps - 1 rows

    x_in = x if Bp == B else jnp.pad(x, ((0, Bp - B), (0, 0)))

    # --- specs -------------------------------------------------------------------
    x_spec = pl.BlockSpec((tile, in_dim), lambda i: (i, 0))           # streamed
    w1_spec = pl.BlockSpec((in_dim, hidden_dim), lambda i: (0, 0))    # resident
    b1_spec = pl.BlockSpec((1, hidden_dim), lambda i: (0, 0))
    w2_spec = pl.BlockSpec((hidden_dim, hidden_dim), lambda i: (0, 0))
    b2_spec = pl.BlockSpec((1, hidden_dim), lambda i: (0, 0))
    w3_spec = pl.BlockSpec((hidden_dim, out_dim), lambda i: (0, 0))
    b3_spec = pl.BlockSpec((1, out_dim), lambda i: (0, 0))
    out_spec = pl.BlockSpec((tile, out_dim), lambda i: (i, 0))
    # TODO(synk): optionally sweep pipeline_mode=pl.Buffered(3) on x/out specs if
    # xprof shows exposed output-writeback DMA; left at the default depth here.

    if num_layers == 3:
        kernel = functools.partial(_paraphraser3_kernel, compute_dtype=compute_dtype)
        in_specs = [x_spec, w1_spec, b1_spec, w2_spec, b2_spec, w3_spec, b3_spec]
        operands = (x_in, w1, b1, w2, b2, w3, b3)
        flops = 2 * Bp * (in_dim * hidden_dim + hidden_dim * hidden_dim
                          + hidden_dim * out_dim)
        transcendentals = 2 * Bp * hidden_dim
        w_bytes = (w1.size * w1.dtype.itemsize + w2.size * w2.dtype.itemsize
                   + w3.size * w3.dtype.itemsize
                   + b1.size * b1.dtype.itemsize + b2.size * b2.dtype.itemsize
                   + b3.size * b3.dtype.itemsize)
    else:  # num_layers == 2: layer1 -> layer3
        kernel = functools.partial(_paraphraser2_kernel, compute_dtype=compute_dtype)
        in_specs = [x_spec, w1_spec, b1_spec, w3_spec, b3_spec]
        operands = (x_in, w1, b1, w3, b3)
        flops = 2 * Bp * (in_dim * hidden_dim + hidden_dim * out_dim)
        transcendentals = Bp * hidden_dim
        w_bytes = (w1.size * w1.dtype.itemsize + w3.size * w3.dtype.itemsize
                   + b1.size * b1.dtype.itemsize + b3.size * b3.dtype.itemsize)

    bytes_accessed = (Bp * in_dim * x.dtype.itemsize
                      + Bp * out_dim * out_dtype.itemsize
                      + w_bytes)
    cost = pl.CostEstimate(flops=int(flops),
                           transcendentals=int(transcendentals),
                           bytes_accessed=int(bytes_accessed))

    out = pl.pallas_call(
        kernel,
        out_shape=jax.ShapeDtypeStruct((Bp, out_dim), out_dtype),
        grid_spec=pl.GridSpec(
            grid=(n_steps,),
            in_specs=in_specs,
            out_specs=out_spec,
        ),
        compiler_params=pltpu.CompilerParams(
            dimension_semantics=("parallel",),
            vmem_limit_bytes=32 * 1024 * 1024,
        ),
        cost_estimate=cost,
    )(*operands)

    return out[:B] if Bp != B else out


# --------------------------------------------------------------------------- helpers
def init_params(key, in_dim, hidden_dim, out_dim):
    """Mimic nn.Linear default init: U(-1/sqrt(fan_in), 1/sqrt(fan_in))."""
    ks = jax.random.split(key, 6)

    def lin(kw, kb, fan_in, fan_out):
        bound = 1.0 / jnp.sqrt(fan_in)
        w = jax.random.uniform(kw, (fan_in, fan_out), jnp.float32, -bound, bound)
        b = jax.random.uniform(kb, (1, fan_out), jnp.float32, -bound, bound)
        return w, b

    w1, b1 = lin(ks[0], ks[1], in_dim, hidden_dim)
    w2, b2 = lin(ks[2], ks[3], hidden_dim, hidden_dim)
    w3, b3 = lin(ks[4], ks[5], hidden_dim, out_dim)
    return (w1, b1, w2, b2, w3, b3)


def paraphraser_reference(x, params, num_layers=3):
    w1, b1, w2, b2, w3, b3 = params
    h = jnp.tanh(x @ w1 + b1)
    if num_layers == 3:
        h = jnp.tanh(h @ w2 + b2)
    return h @ w3 + b3


if __name__ == "__main__":
    # Small shapes consistent with the module: Paraphraser(in_dim=32, hidden_dim=32, out_dim=128)
    B, in_dim, hidden_dim, out_dim = 8, 32, 32, 128

    key = jax.random.PRNGKey(0)
    k_x, k_p = jax.random.split(key)
    x = jax.random.normal(k_x, (B, in_dim), dtype=jnp.float32)
    params = init_params(k_p, in_dim, hidden_dim, out_dim)

    # num_layers == 3 (default module path)
    out3 = jax.block_until_ready(paraphraser_forward(x, params, num_layers=3))
    ref3 = paraphraser_reference(x, params, num_layers=3)
    assert out3.shape == (B, out_dim)
    # bf16 MXU operands + bf16 output -> bf16-appropriate tolerance vs f32 reference.
    assert jnp.allclose(out3.astype(jnp.float32), ref3, atol=3e-2, rtol=3e-2)

    # num_layers == 2 path (set_layers(2) equivalent)
    out2 = jax.block_until_ready(paraphraser_forward(x, params, num_layers=2))
    ref2 = paraphraser_reference(x, params, num_layers=2)
    assert out2.shape == (B, out_dim)
    assert jnp.allclose(out2.astype(jnp.float32), ref2, atol=3e-2, rtol=3e-2)

    print("KERNEL_OK")
</pallas_src>

<mosaic_0001>
module attributes {stable_mosaic.version = 11 : i64} {
  func.func @_paraphraser3_kernel(%arg0: i32, %arg1: memref<16x32xf32, #tpu.memory_space<vmem>>, %arg2: memref<32x32xf32, #tpu.memory_space<vmem>>, %arg3: memref<1x32xf32, #tpu.memory_space<vmem>>, %arg4: memref<32x32xf32, #tpu.memory_space<vmem>>, %arg5: memref<1x32xf32, #tpu.memory_space<vmem>>, %arg6: memref<32x128xf32, #tpu.memory_space<vmem>>, %arg7: memref<1x128xf32, #tpu.memory_space<vmem>>, %arg8: memref<16x128xbf16, #tpu.memory_space<vmem>>) attributes {dimension_semantics = [#tpu.dimension_semantics<parallel>], iteration_bounds = array<i64: 1>, scalar_prefetch = 0 : i64, scratch_operands = 0 : i64, tpu.core_type = #tpu.core_type<tc>, window_params = [{transform_indices = @transform_0, window_bounds = array<i64: 16, 32>}, {pipeline_mode = #tpu.pipeline_mode<synchronous>, transform_indices = @transform_1, window_bounds = array<i64: 32, 32>}, {pipeline_mode = #tpu.pipeline_mode<synchronous>, transform_indices = @transform_2, window_bounds = array<i64: 1, 32>}, {pipeline_mode = #tpu.pipeline_mode<synchronous>, transform_indices = @transform_3, window_bounds = array<i64: 32, 32>}, {pipeline_mode = #tpu.pipeline_mode<synchronous>, transform_indices = @transform_4, window_bounds = array<i64: 1, 32>}, {pipeline_mode = #tpu.pipeline_mode<synchronous>, transform_indices = @transform_5, window_bounds = array<i64: 32, 128>}, {pipeline_mode = #tpu.pipeline_mode<synchronous>, transform_indices = @transform_6, window_bounds = array<i64: 1, 128>}, {transform_indices = @transform_7, window_bounds = array<i64: 16, 128>}]} {
    %c0 = arith.constant 0 : index
    %c0_0 = arith.constant 0 : index
    %0 = vector.load %arg1[%c0, %c0_0] : memref<16x32xf32, #tpu.memory_space<vmem>>, vector<16x32xf32>
    %1 = arith.truncf %0 : vector<16x32xf32> to vector<16x32xbf16>
    %c0_1 = arith.constant 0 : index
    %c0_2 = arith.constant 0 : index
    %2 = vector.load %arg2[%c0_1, %c0_2] : memref<32x32xf32, #tpu.memory_space<vmem>>, vector<32x32xf32>
    %3 = arith.truncf %2 : vector<32x32xf32> to vector<32x32xbf16>
    %cst = arith.constant dense<0.000000e+00> : vector<16x32xf32>
    %4 = tpu.matmul %1, %3, %cst {dimension_numbers = #tpu.dot_dimension_numbers<[1], [0], [0], [1], [0, 0, 1, 1], [], []>} : vector<16x32xbf16>, vector<32x32xbf16>, vector<16x32xf32> -> vector<16x32xf32>
    %c0_3 = arith.constant 0 : index
    %c0_4 = arith.constant 0 : index
    %5 = vector.load %arg3[%c0_3, %c0_4] : memref<1x32xf32, #tpu.memory_space<vmem>>, vector<1x32xf32>
    %6 = vector.broadcast %5 : vector<1x32xf32> to vector<16x32xf32>
    %7 = arith.addf %4, %6 : vector<16x32xf32>
    %8 = math.tanh %7 : vector<16x32xf32>
    %9 = arith.truncf %8 : vector<16x32xf32> to vector<16x32xbf16>
    %c0_5 = arith.constant 0 : index
    %c0_6 = arith.constant 0 : index
    %10 = vector.load %arg4[%c0_5, %c0_6] : memref<32x32xf32, #tpu.memory_space<vmem>>, vector<32x32xf32>
    %11 = arith.truncf %10 : vector<32x32xf32> to vector<32x32xbf16>
    %cst_7 = arith.constant dense<0.000000e+00> : vector<16x32xf32>
    %12 = tpu.matmul %9, %11, %cst_7 {dimension_numbers = #tpu.dot_dimension_numbers<[1], [0], [0], [1], [0, 0, 1, 1], [], []>} : vector<16x32xbf16>, vector<32x32xbf16>, vector<16x32xf32> -> vector<16x32xf32>
    %c0_8 = arith.constant 0 : index
    %c0_9 = arith.constant 0 : index
    %13 = vector.load %arg5[%c0_8, %c0_9] : memref<1x32xf32, #tpu.memory_space<vmem>>, vector<1x32xf32>
    %14 = vector.broadcast %13 : vector<1x32xf32> to vector<16x32xf32>
    %15 = arith.addf %12, %14 : vector<16x32xf32>
    %16 = math.tanh %15 : vector<16x32xf32>
    %17 = arith.truncf %16 : vector<16x32xf32> to vector<16x32xbf16>
    %c0_10 = arith.constant 0 : index
    %c0_11 = arith.constant 0 : index
    %18 = vector.load %arg6[%c0_10, %c0_11] : memref<32x128xf32, #tpu.memory_space<vmem>>, vector<32x128xf32>
    %19 = arith.truncf %18 : vector<32x128xf32> to vector<32x128xbf16>
    %cst_12 = arith.constant dense<0.000000e+00> : vector<16x128xf32>
    %20 = tpu.matmul %17, %19, %cst_12 {dimension_numbers = #tpu.dot_dimension_numbers<[1], [0], [0], [1], [0, 0, 1, 1], [], []>} : vector<16x32xbf16>, vector<32x128xbf16>, vector<16x128xf32> -> vector<16x128xf32>
    %c0_13 = arith.constant 0 : index
    %c0_14 = arith.constant 0 : index
    %21 = vector.load %arg7[%c0_13, %c0_14] : memref<1x128xf32, #tpu.memory_space<vmem>>, vector<1x128xf32>
    %22 = vector.broadcast %21 : vector<1x128xf32> to vector<16x128xf32>
    %23 = arith.addf %20, %22 : vector<16x128xf32>
    %24 = arith.truncf %23 : vector<16x128xf32> to vector<16x128xbf16>
    %c0_15 = arith.constant 0 : index
    %c0_16 = arith.constant 0 : index
    %25 = vector.load %arg8[%c0_15, %c0_16] : memref<16x128xbf16, #tpu.memory_space<vmem>>, vector<16x128xbf16>
    tpu.vector_store %arg8[%c0_15, %c0_16], %24 {strides = array<i32>} : memref<16x128xbf16, #tpu.memory_space<vmem>>, vector<16x128xbf16>,
    return
  }
  func.func @transform_0(%arg0: i32) -> (i32, i32) {
    %c0_i32 = arith.constant 0 : i32
    %c0_i32_0 = arith.constant 0 : i32
    return %arg0, %c0_i32 : i32, i32
  }
  func.func @transform_1(%arg0: i32) -> (i32, i32) {
    %c0_i32 = arith.constant 0 : i32
    %c0_i32_0 = arith.constant 0 : i32
    %c0_i32_1 = arith.constant 0 : i32
    return %c0_i32, %c0_i32_0 : i32, i32
  }
  func.func @transform_2(%arg0: i32) -> (i32, i32) {
    %c0_i32 = arith.constant 0 : i32
    %c0_i32_0 = arith.constant 0 : i32
    %c0_i32_1 = arith.constant 0 : i32
    return %c0_i32, %c0_i32_0 : i32, i32
  }
  func.func @transform_3(%arg0: i32) -> (i32, i32) {
    %c0_i32 = arith.constant 0 : i32
    %c0_i32_0 = arith.constant 0 : i32
    %c0_i32_1 = arith.constant 0 : i32
    return %c0_i32, %c0_i32_0 : i32, i32
  }
  func.func @transform_4(%arg0: i32) -> (i32, i32) {
    %c0_i32 = arith.constant 0 : i32
    %c0_i32_0 = arith.constant 0 : i32
    %c0_i32_1 = arith.constant 0 : i32
    return %c0_i32, %c0_i32_0 : i32, i32
  }
  func.func @transform_5(%arg0: i32) -> (i32, i32) {
    %c0_i32 = arith.constant 0 : i32
    %c0_i32_0 = arith.constant 0 : i32
    %c0_i32_1 = arith.constant 0 : i32
    return %c0_i32, %c0_i32_0 : i32, i32
  }
  func.func @transform_6(%arg0: i32) -> (i32, i32) {
    %c0_i32 = arith.constant 0 : i32
    %c0_i32_0 = arith.constant 0 : i32
    %c0_i32_1 = arith.constant 0 : i32
    return %c0_i32, %c0_i32_0 : i32, i32
  }
  func.func @transform_7(%arg0: i32) -> (i32, i32) {
    %c0_i32 = arith.constant 0 : i32
    %c0_i32_0 = arith.constant 0 : i32
    return %arg0, %c0_i32 : i32, i32
  }
}

</mosaic_0001>

<bundles_post_ra>
// kernel: tpu_custom_call.1
= control target key start
LH: loop header
LB: loop body
LE: loop exit
PB: predicated region body
PF: predicated region fallthrough
CT: control target
= control target key end

     0   :  { %12 = vsyncpa [#allocation3], 0  ;;  %s439_s0 = inlined_call_operand.hbm [shape: f32[16,32], index: 0, kind: input, shape index: {}]   ;;  %s440_s1 = inlined_call_operand.hbm [shape: f32[32,32], index: 1, kind: input, shape index: {}]   ;;  %s441_s2 = inlined_call_operand.vmem [shape: f32[1,32], index: 2, kind: input, shape index: {}]   ;;  %s442_s3 = inlined_call_operand.hbm [shape: f32[32,32], index: 3, kind: input, shape index: {}]   ;;  %s443_s4 = inlined_call_operand.vmem [shape: f32[1,32], index: 4, kind: input, shape index: {}]   ;;  %s444_s5 = inlined_call_operand.hbm [shape: f32[32,128], index: 5, kind: input, shape index: {}]   ;;  %s445_s6 = inlined_call_operand.vmem [shape: f32[1,128], index: 6, kind: input, shape index: {}]   ;;  %s446_s7 = inlined_call_operand.hbm [shape: bf16[16,128], index: 7, kind: output, shape index: {}]  }
   0x1   :  { %13 = vsyncpa [#allocation6], 0 }
   0x2   :  { %14 = vsyncpa [#allocation9], 0 }
   0x3   :  { %15 = vsyncpa [#allocation4], 0  ;;  %s33_s26 = sshll.u32 %s440_s1, 4  ;;  %s363_s27 = smov [#allocation5]   ;;  %s34_s26 = int_to_ptr.hbm [resolvable:$true] %s33_s26 }
   0x4   :  { %s35_s28 = sshll.u32 %s363_s27, 4  ;;  %s20_s8 = sshll.u32 %s439_s0, 4  ;;  %s36_s28 = int_to_ptr.vmem [resolvable:$true] %s35_s28  ;;  %s21_s8 = int_to_ptr.hbm [resolvable:$true] %s20_s8 }
   0x5   :  { %s364_s9 = smov 128   ;;  %s365_s10 = smov 8  }
   0x6   :  { %41 = dma.hbm_to_vmem [thread:$0]  %s34_s26, 512, %s36_s28, [#allocation6], %s364_s9, %s364_s9, %s365_s10  }
   0x7   :  { %s366_s11 = smov [#allocation2]   ;;  %s48_s15 = sshll.u32 %s442_s3, 4  ;;  %s49_s15 = int_to_ptr.hbm [resolvable:$true] %s48_s15 }
   0x8   :  { %s22_s12 = sshll.u32 %s366_s11, 4  ;;  %s63_s17 = sshll.u32 %s444_s5, 4  ;;  %s23_s12 = int_to_ptr.vmem [resolvable:$true] %s22_s12  ;;  %s64_s17 = int_to_ptr.hbm [resolvable:$true] %s63_s17 }
   0x9   :  { %28 = dma.hbm_to_vmem [thread:$0]  %s21_s8, 256, %s23_s12, [#allocation3], %s364_s9, %s364_s9, %s365_s10  }
   0xa   :  { %s367_s18 = smov [#allocation7]   ;;  %s368_s0 = smov [#allocation8]  }
   0xb   :  { %s50_s19 = sshll.u32 %s367_s18, 4  ;;  %s65_s20 = sshll.u32 %s368_s0, 4  ;;  %s51_s19 = int_to_ptr.vmem [resolvable:$true] %s50_s19  ;;  %s66_s20 = int_to_ptr.vmem [resolvable:$true] %s65_s20 }
   0xc   :  { %56 = dma.hbm_to_vmem [thread:$0]  %s49_s15, 512, %s51_s19, [#allocation6], %s364_s9, %s364_s9, %s365_s10  }
   0xd   :  { %71 = dma.hbm_to_vmem [thread:$0]  %s64_s17, 512, %s66_s20, [#allocation9], %s364_s9, %s364_s9, %s365_s10  }
   0xe   :  { %355 = dma.done.wait [#allocation3], 256  }
   0xf   :  { %356 = vsyncadd [#allocation3], 4294967040 }
  0x10   :  { %357 = dma.done.wait [#allocation6], 1024  }
  0x11   :  { %358 = vsyncadd [#allocation6], 4294966272 }
  0x12   :  { %359 = dma.done.wait [#allocation9], 512  }
  0x13   :  { %360 = vsyncadd [#allocation9], 4294966784  ;;  %v96_v0 = vld [vmem:[#allocation5 + $0x10] sm:$0xff]  ;;  %v97_v1 = vld [vmem:[#allocation5 + $0x18] sm:$0xff]  ;;  %vm104_vm0 = vcmask 261120   ;;  %s369_s24 = smov [#allocation10]  }
  0x14   :  { %v94_v2 = vld [vmem:[#allocation5] sm:$0xff]  ;;  %v99_v3 = vpack.c.bf16 %v97_v1, %v96_v0  ;;  %v95_v4 = vld [vmem:[#allocation5 + $0x8] sm:$0xff]  ;;  %v91_v6 = vld [vmem:[#allocation2] sm:$0xff]  ;;  %s190_s25 = sshll.u32 %s369_s24, 4  ;;  %s370_s28 = smov 64   ;;  %s191_s25 = int_to_ptr.vmem [resolvable:$true] %s190_s25 }
  0x15   :  { %v98_v5 = vpack.c.bf16 %v95_v4, %v94_v2  ;;  %v92_v7 = vld [vmem:[#allocation2 + $0x8] sm:$0xff]  ;;  %v127_v9 = vld [vmem:[#allocation7 + $0x10] sm:$0xff]  ;;  %v125_v12 = vld [vmem:[#allocation7] sm:$0xff]  ;;  %s371_s29 = smov 4  }
  0x16   :  { %114 = vmatpush.bf16.msra.mxu0 %v99_v3  ;;  %v93_v8 = vpack.c.bf16 %v92_v7, %v91_v6  ;;  %v128_v10 = vld [vmem:[#allocation7 + $0x18] sm:$0xff]  ;;  %v126_v13 = vld [vmem:[#allocation7 + $0x8] sm:$0xff]  ;;  %v224_v16 = vld [vmem:[%s441_s2] ss:$0 sm:$0xff] }
  0x17   :  { %v130_v11 = vpack.c.bf16 %v128_v10, %v127_v9  ;;  %v129_v14 = vpack.c.bf16 %v126_v13, %v125_v12  ;;  %v157_v23 = vld [vmem:[#allocation8 + $0x10] sm:$0xff]  ;;  %v158_v24 = vld [vmem:[#allocation8 + $0x18] sm:$0xff]  ;;  %v155_v26 = vld [vmem:[#allocation8] sm:$0xff] }
  0x18   :  { %v160_v25 = vpack.c.bf16 %v158_v24, %v157_v23  ;;  %v156_v27 = vld [vmem:[#allocation8 + $0x8] sm:$0xff]  ;;  %v225_v30 = vld [vmem:[%s443_s4] ss:$0 sm:$0xff]  ;;  %s192_s4 = sshll.u32 %s446_s7, 4  ;;  %s193_s4 = int_to_ptr.hbm [resolvable:$true] %s192_s4 }
  0x19   :  { %144 = vmatpush.bf16.msra.mxu1 %v130_v11  ;;  %v159_v28 = vpack.c.bf16 %v156_v27, %v155_v26  ;;  %v226_v38 = vld [vmem:[%s445_s6] ss:$0 sm:$0xff] }
  0x1a   :  { %115 = vmatpush.bf16.msra.mxu0 %v98_v5  ;;  %174 = vmatpush.bf16.msra.mxu2 %v160_v25 }
  0x1d   :  { %207 = vmatmul.msk.bf16.vlgmr.msra.gmra.mxu0 %vm104_vm0, %v93_v8  ;;  %145 = vmatpush.bf16.msra.mxu1 %v129_v14 }
  0x1e   :  { %175 = vmatpush.bf16.msra.mxu2 %v159_v28 }
  0x9a   :  { %v117_v15 = vpop.f32.mrf.mxu0 }
  0x9b   :  { %v118_v17 = vadd.f32 %v224_v16, %v117_v15 }
  0x9d   :  { %227 = vtanh.f32 %v118_v17 }
  0xa2   :  { %v119_v18 = vpop.f32.mrf.mxu0 }
  0xa3   :  { %v120_v19 = vadd.f32 %v224_v16, %v119_v18  ;;  %v228_v20 = vpop.eup %227 }
  0xa5   :  { %229 = vtanh.f32 %v120_v19 }
  0xab   :  { %v230_v21 = vpop.eup %229 }
  0xac   :  { %v124_v22 = vpack.c.bf16 %v230_v21, %v228_v20 }
  0xae   :  { %208 = vmatmul.msk.bf16.vlgmr.msra.gmra.mxu1 %vm104_vm0, %v124_v22 }
 0x12b   :  { %v147_v29 = vpop.f32.mrf.mxu1 }
 0x12c   :  { %v148_v31 = vadd.f32 %v225_v30, %v147_v29 }
 0x12e   :  { %231 = vtanh.f32 %v148_v31 }
 0x133   :  { %v149_v32 = vpop.f32.mrf.mxu1 }
 0x134   :  { %v150_v33 = vadd.f32 %v225_v30, %v149_v32  ;;  %v232_v34 = vpop.eup %231 }
 0x136   :  { %233 = vtanh.f32 %v150_v33 }
 0x13c   :  { %v234_v35 = vpop.eup %233 }
 0x13d   :  { %v154_v36 = vpack.c.bf16 %v234_v35, %v232_v34 }
 0x13f   :  { %209 = vmatmul.msk.bf16.vlgmr.msra.gmra.mxu2 %vm104_vm0, %v154_v36 }
 0x1c2   :  { %v177_v37 = vpop.f32.mrf.mxu2 }
 0x1c3   :  { %v178_v40 = vadd.f32 %v226_v38, %v177_v37 }
 0x1ca   :  { %v179_v39 = vpop.f32.mrf.mxu2 }
 0x1cb   :  { %v180_v41 = vadd.f32 %v226_v38, %v179_v39 }
 0x1cd   :  { %v213_v42 = vpack.c.bf16 %v180_v41, %v178_v40 }
 0x1cf   :  { %214 = vst [vmem:[#allocation10] sm:$0xff] %v213_v42  }
 0x1d0   :  { %198 = dma.vmem_to_hbm [thread:$0]  %s191_s25, 128, %s193_s4, [#allocation4], %s370_s28, %s370_s28, %s371_s29  }
 0x1d1   :  { %361 = dma.done.wait [#allocation4], 128  }
 0x1d2   :  { %362 = vsyncadd [#allocation4], 4294967168 }
 0x1d3   :  { %203 = vsyncpa [#allocation3], 1 }
 0x1d4   :  { %204 = vsyncpa [#allocation6], 1 }
 0x1d5   :  { %205 = vsyncpa [#allocation9], 1 }
 0x1d6   :  { %206 = vsyncpa [#allocation4], 1 }

</bundles_post_ra>
